<compile_context>
chip_gen: v5e
topology: v5e:2x2
jax: 0.10.0
libtpu: 0.0.40
codegen_flags: <defaults>
</compile_context>

<pallas_src>
import functools

import jax
import jax.numpy as jnp
from jax.experimental import pallas as pl
from jax.experimental.pallas import tpu as pltpu


def _downsample_block_kernel(x_ref, w_ref, o_ref, *,
                             stride, ksize_h, ksize_w, h_out, w_out, hs, eps):
    # x_ref: (1, s*s*Hs, Ws, C_in)   phase-decomposed, "same"-padded sample
    # w_ref: (KH*KW*C_in, tile_co)   conv weights, tap-major / channel-minor
    # o_ref: (1, h_out, w_out, tile_co)
    s = stride
    c_in = x_ref.shape[-1]
    tile_co = o_ref.shape[-1]
    hw = h_out * w_out

    # im2col fold: thanks to the phase decomposition every tap is a contiguous
    # static slice; concatenating the taps on the lane axis turns the whole
    # conv into ONE MXU matmul with K = KH*KW*C_in.
    taps = []
    for kh in range(ksize_h):
        for kw in range(ksize_w):
            phase = (kh % s) * s + (kw % s)
            row0 = phase * hs + kh // s          # static
            col0 = kw // s                       # static
            taps.append(x_ref[0, pl.ds(row0, h_out), pl.ds(col0, w_out), :])
    col = jnp.concatenate(taps, axis=-1)                      # (h_out, w_out, K)
    col = col.reshape(hw, ksize_h * ksize_w * c_in)

    # Single matmul; operands stay in their native dtype (bf16 is the fast
    # path), accumulation in f32.  The conv bias is omitted on purpose: it
    # cancels exactly under the InstanceNorm mean subtraction below.
    acc = jnp.dot(col, w_ref[...], preferred_element_type=jnp.float32)

    # InstanceNorm2d (affine=False), biased variance, single sweep over acc.
    inv_hw = 1.0 / hw
    mean = jnp.sum(acc, axis=0, keepdims=True) * inv_hw
    ex2 = jnp.sum(acc * acc, axis=0, keepdims=True) * inv_hw
    var = jnp.maximum(ex2 - mean * mean, 0.0)   # guard tiny negative cancellation
    y = (acc - mean) * jax.lax.rsqrt(var + eps)

    # A * sigmoid(B) with A == B, fused with the cast and lane-dense store.
    out = y * jax.nn.sigmoid(y)
    o_ref[...] = out.reshape(1, h_out, w_out, tile_co).astype(o_ref.dtype)


def _prefer_256_wide_cout():
    """True on TPU generations whose MXU is 256 wide in N (v6e / v7x)."""
    try:
        kind = jax.devices()[0].device_kind.lower()
    except Exception:
        return True
    return not any(tag in kind for tag in ("v2", "v3", "v4", "v5"))


def downsample_block_2d(x, w, b=None, *, stride=2, eps=1e-5):
    """Fused Conv2dSame + InstanceNorm2d + gated output (A * sigmoid(A)).

    x: (B, C_in, H, W) NCHW; w: (C_out, C_in, KH, KW); b: (C_out,) conv bias —
    accepted for API parity but unused: InstanceNorm2d(affine=False) subtracts
    the per-channel mean, so a constant per-channel bias cancels exactly.
    Returns (B, C_out, ceil(H/stride), ceil(W/stride)) in NCHW.
    """
    del b  # cancels exactly under the instance-norm mean subtraction
    bsz, c_in, h_in, w_in = x.shape
    c_out, c_in_w, ksize_h, ksize_w = w.shape
    assert c_in == c_in_w, "channel mismatch"
    s = int(stride)

    h_out = -(-h_in // s)
    w_out = -(-w_in // s)
    # PyTorch Conv2dSame padding (dilation = 1).
    pad_h = max((h_out - 1) * s + (ksize_h - 1) + 1 - h_in, 0)
    pad_w = max((w_out - 1) * s + (ksize_w - 1) + 1 - w_in, 0)
    pad_t, pad_bm = pad_h // 2, pad_h - pad_h // 2
    pad_l, pad_r = pad_w // 2, pad_w - pad_w // 2

    # Extra zero rows/cols (bottom/right) so padded dims divide the stride;
    # these positions are never read by any tap, so results are unaffected.
    hp, wp = h_in + pad_h, w_in + pad_w
    hp_r = -(-hp // s) * s
    wp_r = -(-wp // s) * s

    # NCHW -> NHWC, pad, phase-decompose: stride phases become leading rows so
    # every tap inside the kernel is a contiguous static slice.
    x_nhwc = jnp.transpose(x, (0, 2, 3, 1))
    x_pad = jnp.pad(x_nhwc, ((0, 0),
                             (pad_t, pad_bm + (hp_r - hp)),
                             (pad_l, pad_r + (wp_r - wp)),
                             (0, 0)))
    hs, ws = hp_r // s, wp_r // s
    x_ph = x_pad.reshape(bsz, hs, s, ws, s, c_in)
    x_ph = jnp.transpose(x_ph, (0, 2, 4, 1, 3, 5))
    x_ph = x_ph.reshape(bsz, s * s * hs, ws, c_in)

    # Pad C_out to a lane-dense multiple of 128 (zero weight columns; padded
    # channels stay identically zero through conv/norm/gate, sliced off below).
    c_out_p = -(-c_out // 128) * 128
    n_taps = ksize_h * ksize_w
    # Weights: (C_out, C_in, KH, KW) -> (KH*KW*C_in, C_out_p), tap-major /
    # channel-minor — matches the in-kernel im2col concatenation order.
    w_flat = jnp.transpose(w, (2, 3, 1, 0)).reshape(n_taps * c_in, c_out)
    if c_out_p != c_out:
        w_flat = jnp.pad(w_flat, ((0, 0), (0, c_out_p - c_out)))

    # C_out tile: 256 fills the v6e/v7x MXU N dimension; keep 128 on v5e-class
    # parts and whenever 256 would leave fewer than 2 parallel grid steps.
    tile_co = 128
    if (c_out_p % 256 == 0 and _prefer_256_wide_cout()
            and bsz * (c_out_p // 256) >= 2):
        tile_co = 256
    grid = (bsz, c_out_p // tile_co)

    # Explicit VMEM budget: double-buffered input/weight/output blocks plus the
    # f32 im2col slab and accumulator (default scoped limits are too small for
    # whole-sample blocks on v5e/v7x).
    in_blk = (s * s * hs) * ws * c_in * x.dtype.itemsize
    w_blk = n_taps * c_in * tile_co * w_flat.dtype.itemsize
    out_blk = h_out * w_out * tile_co * x.dtype.itemsize
    tmp_f32 = h_out * w_out * (n_taps * c_in + 2 * tile_co) * 4
    vmem_need = 2 * (in_blk + w_blk + out_blk) + tmp_f32 + (2 << 20)
    vmem_limit = int(min(max(vmem_need, 8 << 20), 64 << 20))

    # The per-sample input block is reused across every C_out tile (its index
    # map ignores j); if it is huge, single-buffer it to halve the largest VMEM
    # allocation — the exposed once-per-sample DMA is negligible because each
    # input element feeds KH*KW*tile_co MACs.
    x_block = (1, s * s * hs, ws, c_in)
    x_index = lambda i, j: (i, 0, 0, 0)
    if 2 * in_blk > (16 << 20):
        x_spec = pl.BlockSpec(x_block, x_index, pipeline_mode=pl.Buffered(1))
    else:
        x_spec = pl.BlockSpec(x_block, x_index)

    kernel = functools.partial(
        _downsample_block_kernel, stride=s, ksize_h=ksize_h, ksize_w=ksize_w,
        h_out=h_out, w_out=w_out, hs=hs, eps=float(eps))

    cost = pl.CostEstimate(
        flops=2 * bsz * h_out * w_out * n_taps * c_in * c_out_p,
        transcendentals=bsz * h_out * w_out * c_out_p + bsz * c_out_p,
        bytes_accessed=int(bsz * (s * s * hs) * ws * c_in * x.dtype.itemsize
                           + bsz * n_taps * c_in * c_out_p * w_flat.dtype.itemsize
                           + bsz * h_out * w_out * c_out_p * x.dtype.itemsize))

    out_nhwc = pl.pallas_call(
        kernel,
        out_shape=jax.ShapeDtypeStruct((bsz, h_out, w_out, c_out_p), x.dtype),
        grid=grid,
        in_specs=[
            x_spec,
            pl.BlockSpec((n_taps * c_in, tile_co), lambda i, j: (0, j)),
        ],
        out_specs=pl.BlockSpec((1, h_out, w_out, tile_co),
                               lambda i, j: (i, 0, 0, j)),
        compiler_params=pltpu.CompilerParams(
            dimension_semantics=("parallel", "parallel"),
            vmem_limit_bytes=vmem_limit),
        cost_estimate=cost,
    )(x_ph, w_flat)

    # Drop padded channels; back to PyTorch's NCHW layout at the API boundary.
    return jnp.transpose(out_nhwc[..., :c_out], (0, 3, 1, 2))


def downsample_block_2d_ref(x, w, b, *, stride=2, eps=1e-5):
    """Pure-JAX reference mirroring the PyTorch module exactly (incl. bias)."""
    c_out, _, ksize_h, ksize_w = w.shape
    h_in, w_in = x.shape[2], x.shape[3]
    s = int(stride)
    pad_h = max((-(-h_in // s) - 1) * s + (ksize_h - 1) + 1 - h_in, 0)
    pad_w = max((-(-w_in // s) - 1) * s + (ksize_w - 1) + 1 - w_in, 0)
    conv = jax.lax.conv_general_dilated(
        x, w, window_strides=(s, s),
        padding=((pad_h // 2, pad_h - pad_h // 2),
                 (pad_w // 2, pad_w - pad_w // 2)),
        dimension_numbers=("NCHW", "OIHW", "NCHW"))
    conv = conv + b[None, :, None, None]
    mean = jnp.mean(conv, axis=(2, 3), keepdims=True)
    var = jnp.mean((conv - mean) ** 2, axis=(2, 3), keepdims=True)
    a_n = (conv - mean) * jax.lax.rsqrt(var + eps)
    return a_n * jax.nn.sigmoid(a_n)   # A == B -> A * sigmoid(A)


if __name__ == "__main__":
    key = jax.random.PRNGKey(0)
    kx, kw, kb = jax.random.split(key, 3)

    B, C_in, H, W = 2, 4, 16, 16
    C_out, K, STRIDE = 8, 3, 2

    # Quantize test data to a coarse dyadic grid so the conv is exact regardless
    # of the default matmul precision (and so the bias cancellation is exact),
    # keeping kernel vs reference tight.
    x = jnp.round(jax.random.normal(kx, (B, C_in, H, W), jnp.float32) * 8.0) / 8.0
    w = jnp.round(jax.random.normal(kw, (C_out, C_in, K, K), jnp.float32) * 8.0) / 64.0
    b = jnp.round(jax.random.normal(kb, (C_out,), jnp.float32) * 8.0) / 8.0

    fwd = jax.jit(lambda xx, ww, bb: downsample_block_2d(xx, ww, bb, stride=STRIDE))
    out = jax.block_until_ready(fwd(x, w, b))

    ref = downsample_block_2d_ref(x, w, b, stride=STRIDE)
    h_out = (H + STRIDE - 1) // STRIDE
    w_out = (W + STRIDE - 1) // STRIDE
    assert out.shape == (B, C_out, h_out, w_out), out.shape
    max_diff = float(jnp.max(jnp.abs(out - ref)))
    assert jnp.allclose(out, ref, rtol=1e-4, atol=1e-4), f"mismatch, max|diff|={max_diff}"

    print("KERNEL_OK")
</pallas_src>

<mosaic_0001>
module attributes {stable_mosaic.version = 11 : i64} {
  func.func @_downsample_block_kernel(%arg0: i32, %arg1: i32, %arg2: memref<1x36x9x4xf32, #tpu.memory_space<vmem>>, %arg3: memref<36x128xf32, #tpu.memory_space<vmem>>, %arg4: memref<1x8x8x128xf32, #tpu.memory_space<vmem>>) attributes {dimension_semantics = [#tpu.dimension_semantics<parallel>, #tpu.dimension_semantics<parallel>], iteration_bounds = array<i64: 2, 1>, scalar_prefetch = 0 : i64, scratch_operands = 0 : i64, tpu.core_type = #tpu.core_type<tc>, window_params = [{transform_indices = @transform_0, window_bounds = array<i64: 1, 36, 9, 4>}, {transform_indices = @transform_1, window_bounds = array<i64: 36, 128>}, {transform_indices = @transform_2, window_bounds = array<i64: 1, 8, 8, 128>}]} {
    %c0 = arith.constant 0 : index
    %c0_0 = arith.constant 0 : index
    %c0_1 = arith.constant 0 : index
    %c0_2 = arith.constant 0 : index
    %0 = vector.load %arg2[%c0, %c0_0, %c0_1, %c0_2] : memref<1x36x9x4xf32, #tpu.memory_space<vmem>>, vector<1x8x8x4xf32>
    %1 = vector.shape_cast %0 : vector<1x8x8x4xf32> to vector<8x8x4xf32>
    %c0_3 = arith.constant 0 : index
    %c9 = arith.constant 9 : index
    %c0_4 = arith.constant 0 : index
    %c0_5 = arith.constant 0 : index
    %2 = vector.load %arg2[%c0_3, %c9, %c0_4, %c0_5] : memref<1x36x9x4xf32, #tpu.memory_space<vmem>>, vector<1x8x8x4xf32>
    %3 = vector.shape_cast %2 : vector<1x8x8x4xf32> to vector<8x8x4xf32>
    %c0_6 = arith.constant 0 : index
    %c0_7 = arith.constant 0 : index
    %c1 = arith.constant 1 : index
    %c0_8 = arith.constant 0 : index
    %4 = vector.load %arg2[%c0_6, %c0_7, %c1, %c0_8] : memref<1x36x9x4xf32, #tpu.memory_space<vmem>>, vector<1x8x8x4xf32>
    %5 = vector.shape_cast %4 : vector<1x8x8x4xf32> to vector<8x8x4xf32>
    %c0_9 = arith.constant 0 : index
    %c18 = arith.constant 18 : index
    %c0_10 = arith.constant 0 : index
    %c0_11 = arith.constant 0 : index
    %6 = vector.load %arg2[%c0_9, %c18, %c0_10, %c0_11] : memref<1x36x9x4xf32, #tpu.memory_space<vmem>>, vector<1x8x8x4xf32>
    %7 = vector.shape_cast %6 : vector<1x8x8x4xf32> to vector<8x8x4xf32>
    %c0_12 = arith.constant 0 : index
    %c27 = arith.constant 27 : index
    %c0_13 = arith.constant 0 : index
    %c0_14 = arith.constant 0 : index
    %8 = vector.load %arg2[%c0_12, %c27, %c0_13, %c0_14] : memref<1x36x9x4xf32, #tpu.memory_space<vmem>>, vector<1x8x8x4xf32>
    %9 = vector.shape_cast %8 : vector<1x8x8x4xf32> to vector<8x8x4xf32>
    %c0_15 = arith.constant 0 : index
    %c18_16 = arith.constant 18 : index
    %c1_17 = arith.constant 1 : index
    %c0_18 = arith.constant 0 : index
    %10 = vector.load %arg2[%c0_15, %c18_16, %c1_17, %c0_18] : memref<1x36x9x4xf32, #tpu.memory_space<vmem>>, vector<1x8x8x4xf32>
    %11 = vector.shape_cast %10 : vector<1x8x8x4xf32> to vector<8x8x4xf32>
    %c0_19 = arith.constant 0 : index
    %c1_20 = arith.constant 1 : index
    %c0_21 = arith.constant 0 : index
    %c0_22 = arith.constant 0 : index
    %12 = vector.load %arg2[%c0_19, %c1_20, %c0_21, %c0_22] : memref<1x36x9x4xf32, #tpu.memory_space<vmem>>, vector<1x8x8x4xf32>
    %13 = vector.shape_cast %12 : vector<1x8x8x4xf32> to vector<8x8x4xf32>
    %c0_23 = arith.constant 0 : index
    %c10 = arith.constant 10 : index
    %c0_24 = arith.constant 0 : index
    %c0_25 = arith.constant 0 : index
    %14 = vector.load %arg2[%c0_23, %c10, %c0_24, %c0_25] : memref<1x36x9x4xf32, #tpu.memory_space<vmem>>, vector<1x8x8x4xf32>
    %15 = vector.shape_cast %14 : vector<1x8x8x4xf32> to vector<8x8x4xf32>
    %c0_26 = arith.constant 0 : index
    %c1_27 = arith.constant 1 : index
    %c1_28 = arith.constant 1 : index
    %c0_29 = arith.constant 0 : index
    %16 = vector.load %arg2[%c0_26, %c1_27, %c1_28, %c0_29] : memref<1x36x9x4xf32, #tpu.memory_space<vmem>>, vector<1x8x8x4xf32>
    %17 = vector.shape_cast %16 : vector<1x8x8x4xf32> to vector<8x8x4xf32>
    %18 = tpu.concatenate %1, %3, %5, %7, %9, %11, %13, %15, %17 in 2 : vector<8x8x4xf32>, vector<8x8x4xf32>, vector<8x8x4xf32>, vector<8x8x4xf32>, vector<8x8x4xf32>, vector<8x8x4xf32>, vector<8x8x4xf32>, vector<8x8x4xf32>, vector<8x8x4xf32> -> vector<8x8x36xf32>
    %19 = vector.shape_cast %18 : vector<8x8x36xf32> to vector<64x36xf32>
    %c0_30 = arith.constant 0 : index
    %c0_31 = arith.constant 0 : index
    %20 = vector.load %arg3[%c0_30, %c0_31] : memref<36x128xf32, #tpu.memory_space<vmem>>, vector<36x128xf32>
    %cst = arith.constant dense<0.000000e+00> : vector<64x128xf32>
    %21 = tpu.matmul %19, %20, %cst {dimension_numbers = #tpu.dot_dimension_numbers<[1], [0], [0], [1], [0, 0, 1, 1], [], []>} : vector<64x36xf32>, vector<36x128xf32>, vector<64x128xf32> -> vector<64x128xf32>
    %cst_32 = arith.constant dense<0.000000e+00> : vector<128xf32>
    %22 = vector.multi_reduction <add>, %21, %cst_32 [0] : vector<64x128xf32> to vector<128xf32>
    %23 = vector.shape_cast %22 : vector<128xf32> to vector<1x128xf32>
    %cst_33 = arith.constant 1.562500e-02 : f32
    %24 = vector.broadcast %cst_33 : f32 to vector<1x128xf32>
    %25 = arith.mulf %23, %24 : vector<1x128xf32>
    %26 = arith.mulf %21, %21 : vector<64x128xf32>
    %cst_34 = arith.constant dense<0.000000e+00> : vector<128xf32>
    %27 = vector.multi_reduction <add>, %26, %cst_34 [0] : vector<64x128xf32> to vector<128xf32>
    %28 = vector.shape_cast %27 : vector<128xf32> to vector<1x128xf32>
    %cst_35 = arith.constant 1.562500e-02 : f32
    %29 = vector.broadcast %cst_35 : f32 to vector<1x128xf32>
    %30 = arith.mulf %28, %29 : vector<1x128xf32>
    %31 = arith.mulf %25, %25 : vector<1x128xf32>
    %32 = arith.subf %30, %31 : vector<1x128xf32>
    %cst_36 = arith.constant 0.000000e+00 : f32
    %33 = vector.broadcast %cst_36 : f32 to vector<1x128xf32>
    %34 = arith.maximumf %32, %33 : vector<1x128xf32>
    %35 = vector.broadcast %25 : vector<1x128xf32> to vector<64x128xf32>
    %36 = arith.subf %21, %35 : vector<64x128xf32>
    %cst_37 = arith.constant 9.99999974E-6 : f32
    %37 = vector.broadcast %cst_37 : f32 to vector<1x128xf32>
    %38 = arith.addf %34, %37 : vector<1x128xf32>
    %39 = math.rsqrt %38 : vector<1x128xf32>
    %40 = vector.broadcast %39 : vector<1x128xf32> to vector<64x128xf32>
    %41 = arith.mulf %36, %40 : vector<64x128xf32>
    %42 = arith.negf %41 : vector<64x128xf32>
    %43 = math.exp %42 : vector<64x128xf32>
    %cst_38 = arith.constant 1.000000e+00 : f32
    %44 = vector.broadcast %cst_38 : f32 to vector<64x128xf32>
    %45 = arith.addf %44, %43 : vector<64x128xf32>
    %46 = arith.divf %44, %45 : vector<64x128xf32>
    %47 = arith.mulf %41, %46 : vector<64x128xf32>
    %48 = vector.shape_cast %47 : vector<64x128xf32> to vector<1x8x8x128xf32>
    %c0_39 = arith.constant 0 : index
    %c0_40 = arith.constant 0 : index
    %c0_41 = arith.constant 0 : index
    %c0_42 = arith.constant 0 : index
    %49 = vector.load %arg4[%c0_39, %c0_40, %c0_41, %c0_42] : memref<1x8x8x128xf32, #tpu.memory_space<vmem>>, vector<1x8x8x128xf32>
    tpu.vector_store %arg4[%c0_39, %c0_40, %c0_41, %c0_42], %48 {strides = array<i32>} : memref<1x8x8x128xf32, #tpu.memory_space<vmem>>, vector<1x8x8x128xf32>,
    return
  }
  func.func @transform_0(%arg0: i32, %arg1: i32) -> (i32, i32, i32, i32) {
    %c0_i32 = arith.constant 0 : i32
    %c0_i32_0 = arith.constant 0 : i32
    %c0_i32_1 = arith.constant 0 : i32
    %c0_i32_2 = arith.constant 0 : i32
    return %arg0, %c0_i32, %c0_i32_0, %c0_i32_1 : i32, i32, i32, i32
  }
  func.func @transform_1(%arg0: i32, %arg1: i32) -> (i32, i32) {
    %c0_i32 = arith.constant 0 : i32
    %c0_i32_0 = arith.constant 0 : i32
    return %c0_i32, %arg1 : i32, i32
  }
  func.func @transform_2(%arg0: i32, %arg1: i32) -> (i32, i32, i32, i32) {
    %c0_i32 = arith.constant 0 : i32
    %c0_i32_0 = arith.constant 0 : i32
    %c0_i32_1 = arith.constant 0 : i32
    return %arg0, %c0_i32, %c0_i32_0, %arg1 : i32, i32, i32, i32
  }
}

</mosaic_0001>

<bundles_post_ra>
// kernel: _lambda_.1
= control target key start
LH: loop header
LB: loop body
LE: loop exit
PB: predicated region body
PF: predicated region fallthrough
CT: control target
= control target key end

     0   :  { %s1202_s9 = smov 0   ;;  %s1204_s10 = smov 0   ;;  %s1722_s0 = inlined_call_operand.vmem [shape: f32[2,36,9,4], index: 0, kind: input, shape index: {}]   ;;  %s1723_s1 = inlined_call_operand.vmem [shape: f32[36,128], index: 1, kind: input, shape index: {}]   ;;  %s1724_s2 = inlined_call_operand.vmem [shape: f32[2,8,8,128], index: 2, kind: output, shape index: {}]  }
   0x1   :  { %s1206_s11 = smov 0  }
   0x2 LB: > { %s24_s12 = sadd.s32 1, %s1173_s10  ;;  %p993_p0 = scmp.ge.s32.totalorder %s1177_s11, 1  ;;  %s1177_s11 = sphi %s1206_s11, %s12_s11   ;;  %s1173_s10 = sphi %s1204_s10, %s1742_s10   ;;  %s1169_s9 = sphi %s1202_s9, %s1741_s9  }
   0x3   : > { %p26_p1 = scmp.ge.s32.totalorder %s24_s12, 2  ;;  %p135_p2 = scmp.lt.s32.totalorder %s1177_s11, 3 }
   0x5   : > { %s1744_s12 = smov (%p26_p1, %s24_s12), 0  ;;  %p136_p3 = pnand %p993_p0, %p135_p2 }
   0x6   : > { %p164_p4 = scmp.lt.s32.totalorder (!%p136_p3), %s1169_s9, 1  ;;  %s1179_s17 = smov (!%p136_p3), 4  }
   0x7   : > { %139 = sbr.rel (%p136_p3) target bundleno = 527 (0x20f), region = 28  ;;  %s1180_s18 = smov (!%p136_p3), 8  }
   0x8   : > { %s1181_s19 = smov (!%p136_p3), 12   ;;  %s1182_s20 = smov (!%p136_p3), 16  }
   0x9   : > { %s1183_s21 = smov (!%p136_p3), 20   ;;  %s1184_s22 = smov (!%p136_p3), 24  }
   0xa   : > { %s1185_s23 = smov (!%p136_p3), 28   ;;  %s1186_s24 = smov (!%p136_p3), 32  }
   0xc   : > { %s1746_s9 = smov (!%p164_p4, %s1169_s9), 1  ;;  %vm523_vm0 = vcmask 64512   ;;  %vm514_vm1 = vcmask 31744   ;;  %v590_v51 = vld [vmem:[%s1723_s1 + $0x20] sm:$0xf]  ;;  %vm616_vm2 = vcmask 1043456  }
   0xd   : > { %s1088_s13 = smul.u32 576, %s1746_s9  ;;  %1053 = vmatpush.msk.msra.mxu0 %vm616_vm2, %v590_v51  ;;  %v589_v53 = vld [vmem:[%s1723_s1 + $0x18] sm:$0xff]  ;;  %1074 = vmatpush.msk.msra.mxu2 %vm616_vm2, %v590_v51  ;;  %v588_v54 = vld [vmem:[%s1723_s1 + $0x10] sm:$0xff]  ;;  %v587_v57 = vld [vmem:[%s1723_s1 + $0x8] sm:$0xff]  ;;  %vm532_vm3 = vcmask 97280   ;;  %vm541_vm4 = vcmask 130048  }
   0xe   : > { %1073 = vmatpush.msk.msra.mxu1 %vm616_vm2, %v590_v51  ;;  %1075 = vmatpush.msk.msra.mxu3 %vm616_vm2, %v590_v51  ;;  %v586_v60 = vld [vmem:[%s1723_s1] sm:$0xff]  ;;  %vm550_vm5 = vcmask 162816   ;;  %vm559_vm6 = vcmask 195584   ;;  %vm568_vm7 = vcmask 228352   ;;  %vm577_vm8 = vcmask 261120   ;;  %s1072_s7 = sshll.u32 %s1746_s9, 6 }
   0xf   : > { %s1226_s16 = scalar_lea.vmem %s1722_s0, %s1088_s13  ;;  %632 = vmatpush.msra.mxu0 %v589_v53  ;;  %1077 = vmatpush.msra.mxu2 %v589_v53  ;;  %vm591_vm9 = vcmask 293888   ;;  %s1684_s13 = scalar_lea.vmem %s1724_s2, %s1072_s7 }
  0x10   : > { %v1229_v0 = vld [vmem:[%s1226_s16 + $0xd0] sm:$0xff]  ;;  %v1233_v2 = vld [vmem:[%s1226_s16 + $0x41] sm:$0xff]  ;;  %1076 = vmatpush.msra.mxu1 %v589_v53  ;;  %1078 = vmatpush.msra.mxu3 %v589_v53 }
  0x11   : > { %v997_v1 = vld [vmem:[%s1226_s16 + $0x90] sm:$0xff]  ;;  %274 = vrot.lane.b32.xlu1 %v1229_v0, %s1179_s17  ;;  %306 = vrot.lane.b32.xlu2 %v1233_v2, %s1180_s18  ;;  %v1005_v3 = vld [vmem:[%s1226_s16 + $0x120] sm:$0xff] }
  0x12   : > { %266 = vrot.lane.b32.xlu0 %v997_v1, %s1179_s17  ;;  %v198_v4 = vld [vmem:[%s1226_s16 + $0x1] sm:$0xff]  ;;  %v1013_v5 = vld [vmem:[%s1226_s16 + $0x1b0] sm:$0xff]  ;;  %633 = vmatpush.msra.mxu0 %v588_v54 }
  0x13   : > { %v1009_v6 = vld [vmem:[%s1226_s16 + $0x160] sm:$0xff]  ;;  %v1248_v7 = vld [vmem:[%s1226_s16 + $0xb0] sm:$0xff]  ;;  %1080 = vmatpush.msra.mxu2 %v588_v54  ;;  %1079 = vmatpush.msra.mxu1 %v588_v54 }
  0x14   : > { %v1021_v8 = vld [vmem:[%s1226_s16 + $0x121] sm:$0xff]  ;;  %v1017_v9 = vld [vmem:[%s1226_s16 + $0x1f0] sm:$0xff]  ;;  %634 = vmatpush.msra.mxu0 %v587_v57  ;;  %1081 = vmatpush.msra.mxu3 %v588_v54 }
  0x15   : > { %v1257_v10 = vld [vmem:[%s1226_s16 + $0x21] sm:$0xff]  ;;  %v1260_v11 = vld [vmem:[%s1226_s16 + $0x10] sm:$0xff]  ;;  %1083 = vmatpush.msra.mxu2 %v587_v57  ;;  %1082 = vmatpush.msra.mxu1 %v587_v57 }
  0x16   : > { %v1007_v12 = vld [vmem:[%s1226_s16 + $0x140] sm:$0xff]  ;;  %v1269_v13 = vld [vmem:[%s1226_s16 + $0xf0] sm:$0xff]  ;;  %635 = vmatpush.msra.mxu0 %v586_v60  ;;  %1084 = vmatpush.msra.mxu3 %v587_v57 }
  0x17   : > { %v1025_v14 = vld [vmem:[%s1226_s16 + $0x161] sm:$0xff]  ;;  %v1015_v17 = vld [vmem:[%s1226_s16 + $0x1d0] sm:$0xff]  ;;  %1086 = vmatpush.msra.mxu2 %v586_v60  ;;  %1085 = vmatpush.msra.mxu1 %v586_v60 }
  0x18   : > { %v1277_v15 = vld [vmem:[%s1226_s16 + $0x61] sm:$0xff]  ;;  %v1045_v18 = vld [vmem:[%s1226_s16 + $0x11] sm:$0xff]  ;;  %1087 = vmatpush.msra.mxu3 %v586_v60 }
  0x19   : > { %330 = vrot.lane.b32.xlu1 %v1005_v3, %s1181_s19  ;;  %362 = vrot.lane.b32.xlu2 %v1013_v5, %s1182_s20  ;;  %v1037_v16 = vld [vmem:[%s1226_s16 + $0xa0] sm:$0xff]  ;;  %v1287_v19 = vld [vmem:[%s1226_s16 + $0x50] sm:$0xff] }
  0x1a   : > { %298 = vrot.lane.b32.xlu0 %v198_v4, %s1180_s18  ;;  %v1023_v20 = vld [vmem:[%s1226_s16 + $0x141] sm:$0xff]  ;;  %v1019_v23 = vld [vmem:[%s1226_s16 + $0x210] sm:$0xff] }
  0x1b   : > { %v1011_v21 = vld [vmem:[%s1226_s16 + $0x180] sm:$0xff]  ;;  %v1301_v24 = vld [vmem:[%s1226_s16 + $0x30] sm:$0xff] }
  0x1c   : > { %v1041_v22 = vld [vmem:[%s1226_s16 + $0xe0] sm:$0xff]  ;;  %v1049_v25 = vld [vmem:[%s1226_s16 + $0x51] sm:$0xff] }
  0x1d   : > { %v1006_v26 = vld [vmem:[%s1226_s16 + $0x130] sm:$0xff]  ;;  %v1039_v27 = vld [vmem:[%s1226_s16 + $0xc0] sm:$0xff] }
  0x1e   : > { %v1027_v28 = vld [vmem:[%s1226_s16 + $0x181] sm:$0xff]  ;;  %v1318_v29 = vld [vmem:[%s1226_s16 + $0x70] sm:$0xff] }
  0x1f   : > { %v1014_v30 = vld [vmem:[%s1226_s16 + $0x1c0] sm:$0xff]  ;;  %v1047_v31 = vld [vmem:[%s1226_s16 + $0x31] sm:$0xff] }
  0x20   : > { %v1010_v33 = vld [vmem:[%s1226_s16 + $0x170] sm:$0xff]  ;;  %v1043_v36 = vld [vmem:[%s1226_s16 + $0x100] sm:$0xff] }
  0x21   : > { %338 = vrot.lane.b32.xlu1 %v1009_v6, %s1181_s19  ;;  %394 = vrot.lane.b32.xlu2 %v1021_v8, %s1183_s21  ;;  %v1022_v34 = vld [vmem:[%s1226_s16 + $0x131] sm:$0xff]  ;;  %v1018_v37 = vld [vmem:[%s1226_s16 + $0x200] sm:$0xff] }
  0x22   : > { %270 = vrot.lane.b32.xlu0 %v1248_v7, %s1179_s17  ;;  %v1051_v39 = vld [vmem:[%s1226_s16 + $0x71] sm:$0xff]  ;;  %v1342_v40 = vld [vmem:[%s1226_s16 + $0x20] sm:$0xff] }
  0x23   : > { %v185_v41 = vld [vmem:[%s1226_s16 + $0x40] sm:$0xff]  ;;  %v1026_v47 = vld [vmem:[%s1226_s16 + $0x171] sm:$0xff] }
  0x24   : > { %v1008_v48 = vld [vmem:[%s1226_s16 + $0x150] sm:$0xff]  ;;  %v1016_v55 = vld [vmem:[%s1226_s16 + $0x1e0] sm:$0xff] }
  0x25   : > { %v1034_v56 = vld [vmem:[%s1226_s16 + $0x60] sm:$0xff]  ;;  %v1012_v62 = vld [vmem:[%s1226_s16 + $0x190] sm:$0xff] }
  0x26   : > { %v1024_v63 = vld [vmem:[%s1226_s16 + $0x151] sm:$0xff]  ;;  %v1020_v5 = vld [vmem:[%s1226_s16 + $0x220] sm:$0xff] }
  0x27   : > { %v181_v6 = vld [vmem:[%s1226_s16] sm:$0xff] }
  0x29   : > { %370 = vrot.lane.b32.xlu1 %v1017_v9, %s1182_s20  ;;  %426 = vrot.lane.b32.xlu2 %v1260_v11, %s1184_s22 }
  0x2a   : > { %302 = vrot.lane.b32.xlu0 %v1257_v10, %s1180_s18 }
  0x31   : > { %334 = vrot.lane.b32.xlu1 %v1007_v12, %s1181_s19  ;;  %402 = vrot.lane.b32.xlu2 %v1025_v14, %s1183_s21  ;;  %v1028_v14 = vld [vmem:[%s1226_s16 + $0x191] sm:$0xff] }
  0x32   : > { %278 = vrot.lane.b32.xlu0 %v1269_v13, %s1179_s17 }
  0x39   : > { %310 = vrot.lane.b32.xlu1 %v1277_v15, %s1180_s18  ;;  %366 = vrot.lane.b32.xlu2 %v1015_v17, %s1182_s20 }
  0x3a   : > { %458 = vrot.lane.b32.xlu0 %v1037_v16, %s1185_s23 }
  0x41   : > { %490 = vrot.lane.b32.xlu1 %v1045_v18, %s1186_s24  ;;  %268 = vrot.lane.b32.xlu2 %v1037_v16, %s1179_s17 }
  0x42   : > { %434 = vrot.lane.b32.xlu0 %v1287_v19, %s1184_s22 }
  0x49   : > { %398 = vrot.lane.b32.xlu1 %v1023_v20, %s1183_s21  ;;  %466 = vrot.lane.b32.xlu2 %v1041_v22, %s1185_s23 }
  0x4a   : > { %342 = vrot.lane.b32.xlu0 %v1011_v21, %s1181_s19 }
  0x51   : > { %374 = vrot.lane.b32.xlu1 %v1019_v23, %s1182_s20  ;;  %430 = vrot.lane.b32.xlu2 %v1301_v24, %s1184_s22 }
  0x52   : > { %300 = vrot.lane.b32.xlu0 %v1045_v18, %s1180_s18 }
  0x59   : > { %276 = vrot.lane.b32.xlu1 %v1041_v22, %s1179_s17  ;;  %332 = vrot.lane.b32.xlu2 %v1006_v26, %s1181_s19  ;;  %v1036_v22 = vld [vmem:[%s1226_s16 + $0x80] sm:$0xff] }
  0x5a   : > { %498 = vrot.lane.b32.xlu0 %v1049_v25, %s1186_s24 }
  0x61   : > { %462 = vrot.lane.b32.xlu1 %v1039_v27, %s1185_s23  ;;  %308 = vrot.lane.b32.xlu2 %v1049_v25, %s1180_s18  ;;  %v1044_v25 = vld [vmem:[%s1226_s16 + $0x110] sm:$0xff] }
  0x62   : > { %406 = vrot.lane.b32.xlu0 %v1027_v28, %s1183_s21 }
  0x69   : > { %438 = vrot.lane.b32.xlu1 %v1318_v29, %s1184_s22  ;;  %494 = vrot.lane.b32.xlu2 %v1047_v31, %s1186_s24 }
  0x6a   : > { %364 = vrot.lane.b32.xlu0 %v1014_v30, %s1182_s20 }
  0x6b   : > { %v307_v32 = vpop.permute.xlu2 %306 }
  0x71   : > { %340 = vrot.lane.b32.xlu1 %v1010_v33, %s1181_s19  ;;  %396 = vrot.lane.b32.xlu2 %v1022_v34, %s1183_s21 }
  0x72   : > { %272 = vrot.lane.b32.xlu0 %v1039_v27, %s1179_s17 }
  0x73   : > { %v1331_v35 = vpop.permute.xlu2 %362 }
  0x79   : > { %304 = vrot.lane.b32.xlu1 %v1047_v31, %s1180_s18  ;;  %372 = vrot.lane.b32.xlu2 %v1018_v37, %s1182_s20  ;;  %v1052_v31 = vld [vmem:[%s1226_s16 + $0x81] sm:$0xff] }
  0x7a   : > { %470 = vrot.lane.b32.xlu0 %v1043_v36, %s1185_s23 }
  0x7b   : > { %v1338_v38 = vpop.permute.xlu2 %394 }
  0x81   : > { %502 = vrot.lane.b32.xlu1 %v1051_v39, %s1186_s24  ;;  %280 = vrot.lane.b32.xlu2 %v1043_v36, %s1179_s17 }
  0x82   : > { %428 = vrot.lane.b32.xlu0 %v1342_v40, %s1184_s22 }
  0x83   : > { %v275_v42 = vpop.permute.xlu1 %274  ;;  %v1352_v45 = vpop.permute.xlu2 %426 }
  0x84   : > { %v1349_v43 = vpop.permute.xlu0 %266  ;;  %v519_v44 = vsel %vm514_vm1, %v185_v41, %v275_v42 }
  0x85   : > { %v1355_v46 = vsel %vm523_vm0, %v519_v44, %v307_v32 }
  0x89   : > { %404 = vrot.lane.b32.xlu1 %v1026_v47, %s1183_s21  ;;  %460 = vrot.lane.b32.xlu2 %v1248_v7, %s1185_s23 }
  0x8a   : > { %336 = vrot.lane.b32.xlu0 %v1008_v48, %s1181_s19 }
  0x8b   : > { %v331_v49 = vpop.permute.xlu1 %330  ;;  %v1366_v52 = vpop.permute.xlu2 %402 }
  0x8c   : > { %v299_v50 = vpop.permute.xlu0 %298 }
  0x91   : > { %368 = vrot.lane.b32.xlu1 %v1016_v55, %s1182_s20  ;;  %436 = vrot.lane.b32.xlu2 %v1034_v56, %s1184_s22 }
  0x92   : > { %312 = vrot.lane.b32.xlu0 %v1051_v39, %s1180_s18 }
  0x93   : > { %v1382_v58 = vpop.permute.xlu1 %338  ;;  %v1389_v61 = vpop.permute.xlu2 %366 }
  0x94   : > { %v1384_v59 = vpop.permute.xlu0 %270  ;;  %v537_v34 = vsel %vm532_vm3, %v1355_v46, %v1382_v58 }
  0x99   : > { %344 = vrot.lane.b32.xlu1 %v1012_v62, %s1181_s19  ;;  %400 = vrot.lane.b32.xlu2 %v1024_v63, %s1183_s21 }
  0x9a   : > { %492 = vrot.lane.b32.xlu0 %v1257_v10, %s1186_s24  ;;  %v515_v10 = vsel %vm514_vm1, %v181_v6, %v1349_v43 }
  0x9b   : > { %v371_v1 = vpop.permute.xlu1 %370  ;;  %v269_v4 = vpop.permute.xlu2 %268  ;;  %v524_v12 = vsel %vm523_vm0, %v515_v10, %v299_v50 }
  0x9c   : > { %v303_v3 = vpop.permute.xlu0 %302 }
  0xa1   : > { %376 = vrot.lane.b32.xlu1 %v1020_v5, %s1182_s20  ;;  %432 = vrot.lane.b32.xlu2 %v185_v41, %s1184_s22 }
  0xa2   : > { %468 = vrot.lane.b32.xlu0 %v1269_v13, %s1185_s23  ;;  %v533_v13 = vsel %vm532_vm3, %v524_v12, %v331_v49 }
  0xa3   : > { %v335_v7 = vpop.permute.xlu1 %334  ;;  %v467_v16 = vpop.permute.xlu2 %466  ;;  %v542_v20 = vsel %vm541_vm4, %v533_v13, %v1331_v35  ;;  %v516_v35 = vsel %vm514_vm1, %v1260_v11, %v269_v4 }
  0xa4   : > { %v279_v8 = vpop.permute.xlu0 %278  ;;  %v551_v23 = vsel %vm550_vm5, %v542_v20, %v1338_v38  ;;  %v546_v38 = vsel %vm541_vm4, %v537_v34, %v371_v1 }
  0xa5   : > { %v521_v9 = vsel %vm514_vm1, %v1034_v56, %v279_v8  ;;  %v555_v43 = vsel %vm550_vm5, %v546_v38, %v1366_v52 }
  0xa9   : > { %408 = vrot.lane.b32.xlu1 %v1028_v14, %s1183_s21  ;;  %464 = vrot.lane.b32.xlu2 %v1229_v0, %s1185_s23  ;;  %v560_v0 = vsel %vm559_vm6, %v551_v23, %v1352_v45  ;;  %v517_v45 = vsel %vm514_vm1, %v1342_v40, %v1384_v59 }
  0xaa   : > { %500 = vrot.lane.b32.xlu0 %v1277_v15, %s1186_s24  ;;  %v526_v11 = vsel %vm523_vm0, %v517_v45, %v303_v3 }
  0xab   : > { %v311_v17 = vpop.permute.xlu1 %310  ;;  %v431_v15 = vpop.permute.xlu2 %430  ;;  %v535_v49 = vsel %vm532_vm3, %v526_v11, %v335_v7 }
  0xac   : > { %v459_v18 = vpop.permute.xlu0 %458  ;;  %v1417_v21 = vsel %vm523_vm0, %v521_v9, %v311_v17  ;;  %v544_v40 = vsel %vm541_vm4, %v535_v49, %v1389_v61 }
  0xad   : > { %v569_v26 = vsel %vm568_vm7, %v560_v0, %v459_v18 }
  0xb1   : > { %496 = vrot.lane.b32.xlu1 %v1233_v2, %s1186_s24  ;;  %472 = vrot.lane.b32.xlu2 %v1044_v25, %s1185_s23 }
  0xb2   : > { %440 = vrot.lane.b32.xlu0 %v1036_v22, %s1184_s22 }
  0xb3   : > { %v491_v27 = vpop.permute.xlu1 %490  ;;  %v333_v33 = vpop.permute.xlu2 %332 }
  0xb4   : > { %v435_v28 = vpop.permute.xlu0 %434  ;;  %v578_v30 = vsel %vm577_vm8, %v569_v26, %v491_v27 }
  0xb5   : > { %1054 = vmatmul.msk.f32.vlgmr.msra.gmra.mxu0 %vm591_vm9, %v578_v30  ;;  %v564_v44 = vsel %vm559_vm6, %v555_v43, %v435_v28 }
  0xb6   : > { %v573_v48 = vsel %vm568_vm7, %v564_v44, %v467_v16 }
  0xba   : > { %504 = vrot.lane.b32.xlu0 %v1052_v31, %s1186_s24 }
  0xbb   : > { %v399_v2 = vpop.permute.xlu1 %398  ;;  %v309_v42 = vpop.permute.xlu2 %308 }
  0xbc   : > { %v343_v32 = vpop.permute.xlu0 %342  ;;  %v553_v53 = vsel %vm550_vm5, %v544_v40, %v399_v2 }
  0xbd   : > { %v562_v56 = vsel %vm559_vm6, %v553_v53, %v431_v15  ;;  %v539_v6 = vsel %vm532_vm3, %v1417_v21, %v343_v32 }
  0xc3   : > { %v375_v36 = vpop.permute.xlu1 %374  ;;  %v495_v54 = vpop.permute.xlu2 %494 }
  0xc4   : > { %v301_v37 = vpop.permute.xlu0 %300  ;;  %v548_v7 = vsel %vm541_vm4, %v539_v6, %v375_v36 }
  0xc5   : > { %v525_v39 = vsel %vm523_vm0, %v516_v35, %v301_v37 }
  0xc6   : > { %v534_v41 = vsel %vm532_vm3, %v525_v39, %v333_v33 }
  0xcb   : > { %v277_v46 = vpop.permute.xlu1 %276  ;;  %v397_v59 = vpop.permute.xlu2 %396 }
  0xcc   : > { %v499_v47 = vpop.permute.xlu0 %498  ;;  %v520_v50 = vsel %vm514_vm1, %v1287_v19, %v277_v46 }
  0xcd   : > { %v582_v51 = vsel %vm577_vm8, %v573_v48, %v499_v47  ;;  %v529_v52 = vsel %vm523_vm0, %v520_v50, %v309_v42 }
  0xce   : > { %1058 = vmatmul.msk.f32.vlgmr.msra.gmra.mxu2 %vm591_vm9, %v582_v51 }
  0xd3   : > { %v463_v55 = vpop.permute.xlu1 %462  ;;  %v373_v3 = vpop.permute.xlu2 %372 }
  0xd4   : > { %v407_v57 = vpop.permute.xlu0 %406  ;;  %v571_v58 = vsel %vm568_vm7, %v562_v56, %v463_v55 }
  0xd5   : > { %v580_v19 = vsel %vm577_vm8, %v571_v58, %v495_v54  ;;  %v557_v8 = vsel %vm550_vm5, %v548_v7, %v407_v57 }
  0xd6   : > { %1056 = vmatmul.msk.f32.vlgmr.msra.gmra.mxu1 %vm591_vm9, %v580_v19 }
  0xdb   : > { %v439_v60 = vpop.permute.xlu1 %438  ;;  %v281_v5 = vpop.permute.xlu2 %280 }
  0xdc   : > { %v365_v62 = vpop.permute.xlu0 %364  ;;  %v566_v9 = vsel %vm559_vm6, %v557_v8, %v439_v60  ;;  %v522_v47 = vsel %vm514_vm1, %v1318_v29, %v281_v5 }
  0xdd   : > { %v543_v23 = vsel %vm541_vm4, %v534_v41, %v365_v62 }
  0xde   : > { %v552_v25 = vsel %vm550_vm5, %v543_v23, %v397_v59 }
  0xe3   : > { %v341_v63 = vpop.permute.xlu1 %340  ;;  %v461_v13 = vpop.permute.xlu2 %460 }
  0xe4   : > { %v273_v1 = vpop.permute.xlu0 %272  ;;  %v538_v31 = vsel %vm532_vm3, %v529_v52, %v341_v63 }
  0xe5   : > { %v547_v33 = vsel %vm541_vm4, %v538_v31, %v373_v3  ;;  %v518_v35 = vsel %vm514_vm1, %v1301_v24, %v273_v1 }
  0xeb   : > { %v305_v61 = vpop.permute.xlu1 %304  ;;  %v437_v20 = vpop.permute.xlu2 %436 }
  0xec   : > { %v471_v4 = vpop.permute.xlu0 %470  ;;  %v527_v37 = vsel %vm523_vm0, %v518_v35, %v305_v61 }
  0xed   : > { %v575_v10 = vsel %vm568_vm7, %v566_v9, %v471_v4 }
  0xf3   : > { %v503_v12 = vpop.permute.xlu1 %502  ;;  %v401_v28 = vpop.permute.xlu2 %400 }
  0xf4   : > { %v429_v14 = vpop.permute.xlu0 %428  ;;  %v584_v16 = vsel %vm577_vm8, %v575_v10, %v503_v12 }
  0xf5   : > { %1060 = vmatmul.msk.f32.vlgmr.msra.gmra.mxu3 %vm591_vm9, %v584_v16  ;;  %v561_v0 = vsel %vm559_vm6, %v552_v25, %v429_v14 }
  0xf6   : > { %v570_v27 = vsel %vm568_vm7, %v561_v0, %v461_v13 }
  0xfb   : > { %v405_v17 = vpop.permute.xlu1 %404  ;;  %v433_v34 = vpop.permute.xlu2 %432 }
  0xfc   : > { %v337_v18 = vpop.permute.xlu0 %336  ;;  %v556_v36 = vsel %vm550_vm5, %v547_v33, %v405_v17 }
  0xfd   : > { %v536_v38 = vsel %vm532_vm3, %v527_v37, %v337_v18  ;;  %v565_v41 = vsel %vm559_vm6, %v556_v36, %v437_v20 }
 0x103   : > { %v369_v22 = vpop.permute.xlu1 %368  ;;  %v465_v24 = vpop.permute.xlu2 %464 }
 0x104   : > { %v313_v21 = vpop.permute.xlu0 %312  ;;  %v545_v39 = vsel %vm541_vm4, %v536_v38, %v369_v22 }
 0x105   : > { %v554_v11 = vsel %vm550_vm5, %v545_v39, %v401_v28  ;;  %v531_v51 = vsel %vm523_vm0, %v522_v47, %v313_v21 }
 0x106   : > { %v563_v46 = vsel %vm559_vm6, %v554_v11, %v433_v34 }
 0x107   : > { %v572_v48 = vsel %vm568_vm7, %v563_v46, %v465_v24 }
 0x10b   : > { %v345_v15 = vpop.permute.xlu1 %344  ;;  %v473_v56 = vpop.permute.xlu2 %472 }
 0x10c   : > { %v493_v26 = vpop.permute.xlu0 %492  ;;  %v540_v40 = vsel %vm532_vm3, %v531_v51, %v345_v15 }
 0x10d   : > { %v579_v30 = vsel %vm577_vm8, %v570_v27, %v493_v26 }
 0x10e   : > { %1055 = vmatmul.msk.f32.gmra.mxu0 %vm591_vm9, %v579_v30 }
 0x113   : > { %v377_v2 = vpop.permute.xlu1 %376 }
 0x114   : > { %v469_v32 = vpop.permute.xlu0 %468  ;;  %v549_v53 = vsel %vm541_vm4, %v540_v40, %v377_v2 }
 0x115   : > { %v574_v42 = vsel %vm568_vm7, %v565_v41, %v469_v32 }
 0x11b   : > { %v409_v43 = vpop.permute.xlu1 %408 }
 0x11c   : > { %v501_v44 = vpop.permute.xlu0 %500  ;;  %v558_v54 = vsel %vm550_vm5, %v549_v53, %v409_v43 }
 0x11d   : > { %v583_v45 = vsel %vm577_vm8, %v574_v42, %v501_v44 }
 0x11e   : > { %1059 = vmatmul.msk.f32.gmra.mxu2 %vm591_vm9, %v583_v45 }
 0x123   : > { %v497_v49 = vpop.permute.xlu1 %496 }
 0x124   : > { %v441_v50 = vpop.permute.xlu0 %440  ;;  %v581_v52 = vsel %vm577_vm8, %v572_v48, %v497_v49 }
 0x125   : > { %1057 = vmatmul.msk.f32.gmra.mxu1 %vm591_vm9, %v581_v52  ;;  %v567_v55 = vsel %vm559_vm6, %v558_v54, %v441_v50 }
 0x126   : > { %v576_v29 = vsel %vm568_vm7, %v567_v55, %v473_v56 }
 0x12c   : > { %v505_v57 = vpop.permute.xlu0 %504 }
 0x12d   : > { %v585_v58 = vsel %vm577_vm8, %v576_v29, %v505_v57 }
 0x12e   : > { %1061 = vmatmul.msk.f32.gmra.mxu3 %vm591_vm9, %v585_v58 }
 0x132   : > { %v1504_v19 = vpop.f32.mrf.mxu0 }
 0x133   : > { %v675_v63 = vmul.f32 %v1504_v19, %v1504_v19 }
 0x151   : > { %v1516_v61 = vpop.f32.mrf.mxu2 }
 0x152   : > { %v679_v12 = vmul.f32 %v1516_v61, %v1516_v61 }
 0x153   : > { %v1508_v60 = vpop.f32.mrf.mxu1 }
 0x154   : > { %v677_v4 = vmul.f32 %v1508_v60, %v1508_v60 }
 0x178   : > { %v655_v16 = vpop.f32.mrf.mxu3 }
 0x179   : > { %v681_v21 = vmul.f32 %v655_v16, %v655_v16 }
 0x18b   : > { %v1506_v59 = vpop.f32.mrf.mxu0 }
 0x18c   : > { %v676_v62 = vmul.f32 %v1506_v59, %v1506_v59  ;;  %v661_v1 = vadd.f32 %v1506_v59, %v1504_v19 }
 0x18e   : > { %v683_v3 = vadd.f32 %v676_v62, %v675_v63  ;;  %v662_v5 = vadd.f32 %v661_v1, %v1508_v60 }
 0x190   : > { %v684_v9 = vadd.f32 %v683_v3, %v677_v4 }
 0x1a1   : > { %v652_v13 = vpop.f32.mrf.mxu2 }
 0x1a2   : > { %v646_v6 = vpop.f32.mrf.mxu1  ;;  %v680_v18 = vmul.f32 %v652_v13, %v652_v13 }
 0x1a3   : > { %v663_v7 = vadd.f32 %v662_v5, %v646_v6  ;;  %v678_v8 = vmul.f32 %v646_v6, %v646_v6 }
 0x1a5   : > { %v685_v10 = vadd.f32 %v684_v9, %v678_v8  ;;  %v664_v14 = vadd.f32 %v663_v7, %v1516_v61 }
 0x1a7   : > { %v686_v17 = vadd.f32 %v685_v10, %v679_v12  ;;  %v665_v20 = vadd.f32 %v664_v14, %v652_v13 }
 0x1a9   : > { %v687_v22 = vadd.f32 %v686_v17, %v680_v18  ;;  %v666_v23 = vadd.f32 %v665_v20, %v655_v16 }
 0x1ab   : > { %v688_v26 = vadd.f32 %v687_v22, %v681_v21 }
 0x1b1   : > { %v658_v25 = vpop.f32.mrf.mxu3 }
 0x1b2   : > { %v667_v0 = vadd.f32 %v666_v23, %v658_v25  ;;  %v682_v15 = vmul.f32 %v658_v25, %v658_v25 }
 0x1b4   : > { %v668_v27 = vrot.slane %v667_v0, 4  ;;  %v689_v28 = vadd.f32 %v688_v26, %v682_v15 }
 0x1b6   : > { %v669_v30 = vadd.f32 %v668_v27, %v667_v0  ;;  %v690_v31 = vrot.slane %v689_v28, 4 }
 0x1b8   : > { %v670_v2 = vrot.slane %v669_v30, 2  ;;  %v691_v32 = vadd.f32 %v690_v31, %v689_v28 }
 0x1ba   : > { %v671_v33 = vadd.f32 %v670_v2, %v669_v30  ;;  %v692_v34 = vrot.slane %v691_v32, 2 }
 0x1bc   : > { %v672_v35 = vrot.slane %v671_v33, 1  ;;  %v693_v36 = vadd.f32 %v692_v34, %v691_v32 }
 0x1be   : > { %v673_v37 = vadd.f32 %v672_v35, %v671_v33  ;;  %v694_v38 = vrot.slane %v693_v36, 1 }
 0x1c0   : > { %v674_v39 = vmul.f32 0.015625, %v673_v37  ;;  %v695_v41 = vadd.f32 %v694_v38, %v693_v36 }
 0x1c2   : > { %v696_v42 = vmul.f32 0.015625, %v695_v41  ;;  %v697_v43 = vmul.f32 %v674_v39, %v674_v39  ;;  %v700_v51 = vsub.f32 %v1504_v19, %v674_v39  ;;  %v701_v52 = vsub.f32 %v1506_v59, %v674_v39 }
 0x1c3   : > { %v702_v40 = vsub.f32 %v1508_v60, %v674_v39  ;;  %v703_v53 = vsub.f32 %v646_v6, %v674_v39  ;;  %v704_v54 = vsub.f32 %v1516_v61, %v674_v39  ;;  %v705_v55 = vsub.f32 %v652_v13, %v674_v39 }
 0x1c4   : > { %v698_v44 = vsub.f32 %v696_v42, %v697_v43  ;;  %v706_v63 = vsub.f32 %v655_v16, %v674_v39  ;;  %v707_v60 = vsub.f32 %v658_v25, %v674_v39 }
 0x1c6   : > { %v699_v45 = vmax.f32 %v698_v44, 0.0 }
 0x1c8   : > { %v708_v11 = vadd.f32 1e-05, %v699_v45 }
 0x1ca   : > { %1121 = vrsqrt.f32 %v708_v11  ;;  %vm715_vm11 = vweird.f32 %v708_v11 }
 0x1d0   : > { %v1122_v24 = vpop.eup %1121 }
 0x1d1   : > { %v710_v46 = vmul.f32 %v1122_v24, %v708_v11  ;;  %vm716_vm10 = vweird.f32 %v1122_v24 }
 0x1d2   : > { %vm717_vm12 = vmor %vm715_vm11, %vm716_vm10 }
 0x1d3   : > { %v711_v47 = vmul.f32 %v1122_v24, %v710_v46 }
 0x1d5   : > { %v712_v48 = vmul.f32 0.5, %v711_v47 }
 0x1d7   : > { %v713_v49 = vsub.f32 1.5, %v712_v48 }
 0x1d9   : > { %v714_v50 = vmul.f32 %v1122_v24, %v713_v49 }
 0x1db   : > { %v718_v56 = vsel %vm717_vm12, %v1122_v24, %v714_v50 }
 0x1dc   : > { %v1528_v29 = vmul.f32 %v718_v56, %v700_v51  ;;  %v1530_v57 = vmul.f32 %v718_v56, %v701_v52  ;;  %v1532_v58 = vmul.f32 %v718_v56, %v702_v40  ;;  %v1534_v62 = vmul.f32 %v718_v56, %v703_v53 }
 0x1dd   : > { %v1536_v19 = vmul.f32 %v718_v56, %v704_v54  ;;  %v1538_v59 = vmul.f32 %v718_v56, %v705_v55  ;;  %v1543_v4 = vmul.f32 %v718_v56, %v706_v63  ;;  %v1546_v6 = vmul.f32 %v718_v56, %v707_v60 }
 0x1de   : > { %v1062_v1 = vmul.f32 -1.442695, %v1528_v29  ;;  %v1063_v3 = vmul.f32 -1.442695, %v1530_v57  ;;  %v1064_v61 = vmul.f32 -1.442695, %v1532_v58 }
 0x1df   : > { %v1065_v5 = vmul.f32 -1.442695, %v1534_v62  ;;  %v1066_v7 = vmul.f32 -1.442695, %v1536_v19  ;;  %v1067_v8 = vmul.f32 -1.442695, %v1538_v59 }
 0x1e0   : > { %1123 = vpow2.f32 %v1062_v1  ;;  %v1068_v9 = vmul.f32 -1.442695, %v1543_v4  ;;  %v1069_v10 = vmul.f32 -1.442695, %v1546_v6 }
 0x1e1   : > { %1125 = vpow2.f32 %v1063_v3 }
 0x1e2   : > { %1127 = vpow2.f32 %v1064_v61 }
 0x1e3   : > { %1129 = vpow2.f32 %v1065_v5 }
 0x1e4   : > { %1131 = vpow2.f32 %v1066_v7 }
 0x1e5   : > { %1133 = vpow2.f32 %v1067_v8 }
 0x1e6   : > { %v1124_v12 = vpop.eup %1123  ;;  %1135 = vpow2.f32 %v1068_v9 }
 0x1e7   : > { %v1126_v14 = vpop.eup %1125  ;;  %v1552_v16 = vadd.f32 1.0, %v1124_v12  ;;  %1137 = vpow2.f32 %v1069_v10 }
 0x1e8   : > { %v1128_v13 = vpop.eup %1127  ;;  %v1554_v17 = vadd.f32 1.0, %v1126_v14 }
 0x1e9   : > { %v1130_v18 = vpop.eup %1129  ;;  %v1556_v20 = vadd.f32 1.0, %v1128_v13  ;;  %1139 = vrcp.f32 %v1552_v16  ;;  %v770_v0 = vand.u32 2147483648, %v1552_v16  ;;  %vm764_vm13 = vweird.f32 %v1552_v16 }
 0x1ea   : > { %v1132_v22 = vpop.eup %1131  ;;  %v1559_v21 = vadd.f32 1.0, %v1130_v18  ;;  %1141 = vrcp.f32 %v1554_v17  ;;  %v785_v26 = vand.u32 2147483648, %v1554_v17  ;;  %v768_v31 = vand.u32 2147483647, %v1552_v16 }
 0x1eb   : > { %v1134_v23 = vpop.eup %1133  ;;  %v1562_v25 = vadd.f32 1.0, %v1132_v22  ;;  %1143 = vrcp.f32 %v1556_v20  ;;  %v771_v33 = vor.u32 1.1754944e-38, %v770_v0  ;;  %vm779_vm14 = vweird.f32 %v1554_v17 }
 0x1ec   : > { %v1136_v15 = vpop.eup %1135  ;;  %v1567_v28 = vadd.f32 1.0, %v1134_v23  ;;  %1145 = vrcp.f32 %v1559_v21  ;;  %v783_v34 = vand.u32 2147483647, %v1554_v17  ;;  %v800_v35 = vand.u32 2147483648, %v1556_v20 }
 0x1ed   : > { %v1138_v27 = vpop.eup %1137  ;;  %1147 = vrcp.f32 %v1562_v25  ;;  %v1582_v36 = vadd.f32 1.0, %v1136_v15  ;;  %v786_v38 = vor.u32 1.1754944e-38, %v785_v26  ;;  %vm794_vm15 = vweird.f32 %v1556_v20 }
 0x1ee   : > { %v798_v39 = vand.u32 2147483647, %v1556_v20  ;;  %v1590_v42 = vadd.f32 1.0, %v1138_v27  ;;  %v813_v44 = vand.u32 2147483647, %v1559_v21  ;;  %1149 = vrcp.f32 %v1567_v28 }
 0x1ef   : > { %v1570_v30 = vpop.eup %1139  ;;  %vm1595_vm1 = vcmp.eq.f32.partialorder %v768_v31, 8.507059e+37  ;;  %vm809_vm2 = vweird.f32 %v1559_v21  ;;  %v815_v46 = vand.u32 2147483648, %v1559_v21  ;;  %vm1604_vm3 = vcmp.eq.f32.partialorder %v783_v34, 8.507059e+37 }
 0x1f0   : > { %v1575_v2 = vpop.eup %1141  ;;  %v760_v32 = vmul.f32 %v1570_v30, %v1552_v16  ;;  %vm765_vm0 = vweird.f32 %v1570_v30  ;;  %v801_v50 = vor.u32 1.1754944e-38, %v800_v35  ;;  %vm824_vm4 = vweird.f32 %v1562_v25 }
 0x1f1   : > { %v775_v37 = vmul.f32 %v1575_v2, %v1554_v17  ;;  %v1588_v41 = vpop.eup %1143  ;;  %v828_v51 = vand.u32 2147483647, %v1562_v25  ;;  %vm780_vm5 = vweird.f32 %v1575_v2  ;;  %vm1612_vm6 = vcmp.eq.f32.partialorder %v798_v39, 8.507059e+37  ;;  %vm1631_vm9 = vmor %vm764_vm13, %vm765_vm0 }
 0x1f2   : > { %v761_v43 = vsub.f32 1.0, %v760_v32  ;;  %v790_v24 = vmul.f32 %v1588_v41, %v1556_v20  ;;  %v1146_v47 = vpop.eup %1145  ;;  %vm1618_vm7 = vcmp.eq.f32.partialorder %v813_v44, 8.507059e+37  ;;  %v830_v1 = vand.u32 2147483648, %v1562_v25  ;;  %vm1647_vm11 = vmor %vm779_vm14, %vm780_vm5 }
 0x1f3   : > { %v776_v11 = vsub.f32 1.0, %v775_v37  ;;  %v1148_v52 = vpop.eup %1147  ;;  %v805_v55 = vmul.f32 %v1146_v47, %v1559_v21  ;;  %vm795_vm8 = vweird.f32 %v1588_v41  ;;  %v816_v9 = vor.u32 1.1754944e-38, %v815_v46 }
 0x1f4   : > { %v762_v48 = vmul.f32 %v1570_v30, %v761_v43  ;;  %v791_v53 = vsub.f32 1.0, %v790_v24  ;;  %v820_v60 = vmul.f32 %v1148_v52, %v1562_v25  ;;  %v1150_v7 = vpop.eup %1149  ;;  %vm1635_vm10 = vcmp.eq.f32.partialorder %v828_v51, 8.507059e+37  ;;  %vm1657_vm13 = vmor %vm794_vm15, %vm795_vm8 }
 0x1f5   : > { %v777_v40 = vmul.f32 %v1575_v2, %v776_v11  ;;  %v806_v5 = vsub.f32 1.0, %v805_v55  ;;  %1151 = vrcp.f32 %v1582_v36  ;;  %vm810_vm12 = vweird.f32 %v1146_v47 }
 0x1f6   : > { %v763_v56 = vadd.f32 %v1570_v30, %v762_v48  ;;  %v792_v61 = vmul.f32 %v1588_v41, %v791_v53  ;;  %v821_v10 = vsub.f32 1.0, %v820_v60  ;;  %vm825_vm0 = vweird.f32 %v1148_v52  ;;  %vm811_vm14 = vmor %vm809_vm2, %vm810_vm12 }
 0x1f7   : > { %v778_v3 = vadd.f32 %v1575_v2, %v777_v40  ;;  %v807_v18 = vmul.f32 %v1146_v47, %v806_v5  ;;  %v835_v17 = vmul.f32 %v1150_v7, %v1567_v28  ;;  %v831_v27 = vor.u32 1.1754944e-38, %v830_v1  ;;  %vm826_vm15 = vmor %vm824_vm4, %vm825_vm0 }
 0x1f8   : > { %v767_v14 = vsel %vm1631_vm9, %v1570_v30, %v763_v56  ;;  %v793_v13 = vadd.f32 %v1588_v41, %v792_v61  ;;  %v822_v0 = vmul.f32 %v1148_v52, %v821_v10  ;;  %v843_v30 = vand.u32 2147483647, %v1567_v28 }
 0x1f9   : > { %v782_v22 = vsel %vm1647_vm11, %v1575_v2, %v778_v3  ;;  %v808_v26 = vadd.f32 %v1146_v47, %v807_v18  ;;  %v772_v20 = vsel %vm1595_vm1, %v771_v33, %v767_v14  ;;  %v836_v2 = vsub.f32 1.0, %v835_v17 }
 0x1fa   : > { %v797_v15 = vsel %vm1657_vm13, %v1588_v41, %v793_v13  ;;  %v823_v31 = vadd.f32 %v1148_v52, %v822_v0  ;;  %v845_v32 = vand.u32 2147483648, %v1567_v28  ;;  %v787_v34 = vsel %vm1604_vm3, %v786_v38, %v782_v22 }
 0x1fb   : > { %v812_v35 = vsel %vm811_vm14, %v1146_v47, %v808_v26  ;;  %vm840_vm5 = vweird.f32 %v1150_v7  ;;  %1153 = vrcp.f32 %v1590_v42  ;;  %v1152_v37 = vpop.eup %1151  ;;  %v802_v33 = vsel %vm1612_vm6, %v801_v50, %v797_v15 }
 0x1fc   : > { %v817_v21 = vsel %vm1618_vm7, %v816_v9, %v812_v35  ;;  %v827_v39 = vsel %vm826_vm15, %v1148_v52, %v823_v31  ;;  %v837_v41 = vmul.f32 %v1150_v7, %v836_v2  ;;  %v850_v38 = vmul.f32 %v1152_v37, %v1582_v36 }
 0x1fd   : > { %v832_v25 = vsel %vm1635_vm10, %v831_v27, %v827_v39  ;;  %vm839_vm1 = vweird.f32 %v1567_v28  ;;  %v879_v44 = vmul.f32 %v772_v20, %v1528_v29  ;;  %v880_v45 = vmul.f32 %v787_v34, %v1530_v57 }
 0x1fe   : > { %v838_v43 = vadd.f32 %v1150_v7, %v837_v41  ;;  %vm841_vm2 = vmor %vm839_vm1, %vm840_vm5  ;;  %v846_v11 = vor.u32 1.1754944e-38, %v845_v32  ;;  %v851_v24 = vsub.f32 1.0, %v850_v38  ;;  %v881_v46 = vmul.f32 %v802_v33, %v1532_v58 }
 0x1ff   : > { %v882_v47 = vmul.f32 %v817_v21, %v1534_v62  ;;  %vm844_vm3 = vcmp.eq.f32.partialorder %v843_v30, 8.507059e+37  ;;  %v860_v49 = vand.u32 2147483648, %v1582_v36  ;;  %v883_v28 = vmul.f32 %v832_v25, %v1536_v19  ;;  %887 = vst [vmem:[%s1684_s13] sm:$0xff] %v879_v44 }
 0x200   : > { %v842_v48 = vsel %vm841_vm2, %v1150_v7, %v838_v43  ;;  %v852_v50 = vmul.f32 %v1152_v37, %v851_v24  ;;  %vm855_vm4 = vweird.f32 %v1152_v37  ;;  %v858_v51 = vand.u32 2147483647, %v1582_v36  ;;  %888 = vst [vmem:[%s1684_s13 + $0x8] sm:$0xff] %v880_v45 }
 0x201   : > { %v1154_v29 = vpop.eup %1153  ;;  %v847_v57 = vsel %vm844_vm3, %v846_v11, %v842_v48  ;;  %889 = vst [vmem:[%s1684_s13 + $0x10] sm:$0xff] %v881_v46  ;;  %vm854_vm6 = vweird.f32 %v1582_v36  ;;  %v861_v19 = vor.u32 1.1754944e-38, %v860_v49  ;;  %v875_v54 = vand.u32 2147483648, %v1590_v42 }
 0x202   : > { %v865_v58 = vmul.f32 %v1154_v29, %v1590_v42  ;;  %v884_v62 = vmul.f32 %v847_v57, %v1538_v59  ;;  %v853_v52 = vadd.f32 %v1152_v37, %v852_v50  ;;  %890 = vst [vmem:[%s1684_s13 + $0x18] sm:$0xff] %v882_v47  ;;  %vm856_vm7 = vmor %vm854_vm6, %vm855_vm4  ;;  %vm859_vm8 = vcmp.eq.f32.partialorder %v858_v51, 8.507059e+37 }
 0x203   : > { %891 = vst [vmem:[%s1684_s13 + $0x20] sm:$0xff] %v883_v28  ;;  %vm870_vm9 = vweird.f32 %v1154_v29  ;;  %v873_v59 = vand.u32 2147483647, %v1590_v42  ;;  %vm869_vm10 = vweird.f32 %v1590_v42  ;;  %v876_v60 = vor.u32 1.1754944e-38, %v875_v54 }
 0x204   : > { %v866_v40 = vsub.f32 1.0, %v865_v58  ;;  %v857_v53 = vsel %vm856_vm7, %v1152_v37, %v853_v52  ;;  %892 = vst [vmem:[%s1684_s13 + $0x28] sm:$0xff] %v884_v62  ;;  %vm871_vm11 = vmor %vm869_vm10, %vm870_vm9 }
 0x205   : > { %v862_v55 = vsel %vm859_vm8, %v861_v19, %v857_v53  ;;  %vm874_vm12 = vcmp.eq.f32.partialorder %v873_v59, 8.507059e+37 }
 0x206   : > { %v867_v56 = vmul.f32 %v1154_v29, %v866_v40  ;;  %v885_v63 = vmul.f32 %v862_v55, %v1543_v4 }
 0x208   : > { %v868_v36 = vadd.f32 %v1154_v29, %v867_v56  ;;  %893 = vst [vmem:[%s1684_s13 + $0x30] sm:$0xff] %v885_v63 }
 0x20a   : > { %v872_v1 = vsel %vm871_vm11, %v1154_v29, %v868_v36 }
 0x20b   : > { %v877_v3 = vsel %vm874_vm12, %v876_v60, %v872_v1 }
 0x20c   : > { %v886_v61 = vmul.f32 %v877_v3, %v1546_v6 }
 0x20e   : > { %894 = vst [vmem:[%s1684_s13 + $0x38] sm:$0xff] %v886_v61 }
 0x20f PF: > { %s12_s11 = sadd.s32 1, %s1177_s11   ;;  %s1741_s9 = smov %s1173_s10 }
 0x210   : > { %p9_p5 = scmp.ge.s32.totalorder %s12_s11, 4   ;;  %s1742_s10 = smov %s1744_s12 }
 0x212   :  { %11 = sbr.rel (!%p9_p5) target bundleno = 2 (0x2), region = 66 }

</bundles_post_ra>
